<compile_context>
chip_gen: v5e
topology: v5e:2x2
jax: 0.10.0
libtpu: 0.0.40
codegen_flags: <defaults>
</compile_context>

<pallas_src>
import jax
import jax.numpy as jnp
from jax.experimental import pallas as pl
from jax.experimental.pallas import tpu as pltpu

_BN_EPS = 1e-5      # PyTorch BatchNorm1d default eps
_LANE = 128         # lane width
_SUBLANE = 16       # bf16 sublane packing for the batch (row) axis


def _round_up(x, m):
    return (x + m - 1) // m * m


def _make_fused_mlp_kernel(n_layers, n_true, n_pad):
    """Builds a fully-unrolled fused (Linear -> ReLU -> BatchNorm1d)^L kernel.

    Ref layout (positional): x, (w_0, v_0), ..., (w_{L-1}, v_{L-1}), out
      x   : (n_pad, c_pad_0)        bf16
      w_l : (c_pad_l, c_pad_{l+1})  bf16  (x @ W layout, per-layer padding)
      v_l : (3, c_pad_{l+1})        f32   rows = [bias, gamma, beta]
      out : (n_pad, c_pad_L)        f32
    """
    need_row_mask = n_pad != n_true
    inv_n = 1.0 / float(n_true)

    def kernel(x_ref, *refs):
        out_ref = refs[-1]
        act = x_ref[...]                                   # bf16 (n_pad, c_pad_0)

        if need_row_mask:
            rows = jax.lax.broadcasted_iota(jnp.int32, (n_pad, 1), 0)
            row_mask = (rows < n_true).astype(jnp.float32)

        for l in range(n_layers):
            w = refs[2 * l][...]                           # bf16 (c_in_pad, c_out_pad)
            vec = refs[2 * l + 1][...]                     # f32  (3, c_out_pad)
            bias, gamma, beta = vec[0:1, :], vec[1:2, :], vec[2:3, :]

            # Linear on the MXU: bf16 operands, f32 accumulation.
            z = jnp.dot(act, w, preferred_element_type=jnp.float32) + bias
            # ReLU.
            z = jnp.maximum(z, 0.0)

            # Training-mode BatchNorm1d (biased variance), single pass over z.
            # Padded batch rows (if any) are excluded from the statistics.
            zm = z * row_mask if need_row_mask else z
            s1 = jnp.sum(zm, axis=0, keepdims=True)
            s2 = jnp.sum(zm * zm, axis=0, keepdims=True)
            mean = s1 * inv_n
            var = jnp.maximum(s2 * inv_n - mean * mean, 0.0)
            inv_std = jax.lax.rsqrt(var + _BN_EPS)
            out = gamma * ((z - mean) * inv_std) + beta

            if l + 1 < n_layers:
                act = out.astype(jnp.bfloat16)             # next layer's MXU operand
            else:
                out_ref[...] = out

    return kernel


@jax.jit
def mlp_forward(x, params):
    """Fused Pallas forward. params: tuple of (w (Cin,Cout), b, gamma, beta)."""
    n, c_in = x.shape
    n_layers = len(params)
    c_dims = [c_in] + [w.shape[1] for (w, _, _, _) in params]
    c_pads = [_round_up(c, _LANE) for c in c_dims]      # per-layer lane padding
    n_pad = _round_up(n, _SUBLANE)

    x_pad = jnp.pad(x, ((0, n_pad - n), (0, c_pads[0] - c_in))).astype(jnp.bfloat16)

    # Per-layer padded weights (bf16) and merged [bias; gamma; beta] vectors (f32).
    # Zero padding keeps padded lanes exactly zero through every layer
    # (zero weight cols/bias -> relu(0)=0; gamma=beta=0 -> BN output 0).
    inputs = [x_pad]
    for l, (w, b, gamma, beta) in enumerate(params):
        ci, co = w.shape
        ci_p, co_p = c_pads[l], c_pads[l + 1]
        w_pad = jnp.pad(w, ((0, ci_p - ci), (0, co_p - co))).astype(jnp.bfloat16)
        vec = jnp.stack([b, gamma, beta]).astype(jnp.float32)      # (3, co)
        vec_pad = jnp.pad(vec, ((0, 0), (0, co_p - co)))
        inputs += [w_pad, vec_pad]

    # VMEM budget: resident inputs + per-layer f32 temporaries + output, with
    # headroom, clamped to this chip's physical VMEM (64 MiB on v7x, 128 on v5e/v6e).
    in_bytes = sum(int(a.size) * a.dtype.itemsize for a in inputs)
    act_bytes = sum(n_pad * c_pads[l + 1] * 4 for l in range(n_layers))
    out_bytes = n_pad * c_pads[-1] * 4
    needed = in_bytes + act_bytes + out_bytes
    vmem_cap = 128 * 1024 * 1024
    try:
        vmem_cap = int(getattr(pltpu.get_tpu_info(), "vmem_capacity_bytes", vmem_cap))
    except Exception:
        pass
    vmem_limit = int(min(max(2 * needed, 32 * 1024 * 1024), vmem_cap - 2 * 1024 * 1024))

    flops = sum(2 * n_pad * c_pads[l] * c_pads[l + 1] for l in range(n_layers))
    cost = pl.CostEstimate(
        flops=flops,
        transcendentals=sum(c_pads[l + 1] for l in range(n_layers)),
        bytes_accessed=in_bytes + out_bytes,
    )

    kernel = _make_fused_mlp_kernel(n_layers, n, n_pad)

    # No grid: the whole network runs as one kernel invocation with everything
    # VMEM-resident (here a few (128,128) bf16 weight tiles + small slabs).
    out_pad = pl.pallas_call(
        kernel,
        out_shape=jax.ShapeDtypeStruct((n_pad, c_pads[-1]), jnp.float32),
        compiler_params=pltpu.CompilerParams(vmem_limit_bytes=vmem_limit),
        cost_estimate=cost,
    )(*inputs)

    # Lane/row-dense padded slab -> logical shape.
    return out_pad[:n, :c_dims[-1]]


def init_mlp_params(key, channels):
    """Shapes/init mirroring the PyTorch module (Linear defaults, BN gamma=1/beta=0).

    Linear weight is kept transposed as (in, out) so the kernel computes x @ W.
    """
    params = []
    for i in range(1, len(channels)):
        c_in, c_out = channels[i - 1], channels[i]
        key, kw, kb = jax.random.split(key, 3)
        bound = 1.0 / float(c_in) ** 0.5
        w = jax.random.uniform(kw, (c_in, c_out), jnp.float32, -bound, bound)
        b = jax.random.uniform(kb, (c_out,), jnp.float32, -bound, bound)
        gamma = jnp.ones((c_out,), jnp.float32)
        beta = jnp.zeros((c_out,), jnp.float32)
        params.append((w, b, gamma, beta))
    return tuple(params)


def mlp_reference(x, params):
    """Plain-JAX reference (same bf16-operand matmul, f32 training-mode BN math)."""
    out = x
    for (w, b, gamma, beta) in params:
        z = jnp.dot(out.astype(jnp.bfloat16), w.astype(jnp.bfloat16),
                    preferred_element_type=jnp.float32) + b.reshape(1, -1)
        z = jnp.maximum(z, 0.0)
        mean = jnp.mean(z, axis=0, keepdims=True)
        var = jnp.mean((z - mean) ** 2, axis=0, keepdims=True)
        out = (gamma.reshape(1, -1) * (z - mean) * jax.lax.rsqrt(var + _BN_EPS)
               + beta.reshape(1, -1))
    return out


if __name__ == "__main__":
    key = jax.random.PRNGKey(0)
    channels = [16, 32, 64]   # MLP([16, 32, 64]) -> two (Linear, ReLU, BN) blocks
    batch = 32

    key, kx = jax.random.split(key)
    x = jax.random.normal(kx, (batch, channels[0]), jnp.float32)
    params = init_mlp_params(key, channels)

    out = jax.block_until_ready(mlp_forward(x, params))
    ref = mlp_reference(x, params)

    assert out.shape == (batch, channels[-1])
    max_err = float(jnp.max(jnp.abs(out - ref)))
    assert max_err < 1e-2, f"Pallas result mismatch, max abs err = {max_err}"

    print("KERNEL_OK")
</pallas_src>

<mosaic_0001>
module attributes {stable_mosaic.version = 11 : i64} {
  func.func @kernel(%arg0: memref<32x128xbf16, #tpu.memory_space<vmem>>, %arg1: memref<128x128xbf16, #tpu.memory_space<vmem>>, %arg2: memref<3x128xf32, #tpu.memory_space<vmem>>, %arg3: memref<128x128xbf16, #tpu.memory_space<vmem>>, %arg4: memref<3x128xf32, #tpu.memory_space<vmem>>, %arg5: memref<32x128xf32, #tpu.memory_space<vmem>>) attributes {dimension_semantics = [], scalar_prefetch = 0 : i64, scratch_operands = 0 : i64, tpu.core_type = #tpu.core_type<tc>} {
    %c0 = arith.constant 0 : index
    %c0_0 = arith.constant 0 : index
    %0 = vector.load %arg0[%c0, %c0_0] : memref<32x128xbf16, #tpu.memory_space<vmem>>, vector<32x128xbf16>
    %c0_1 = arith.constant 0 : index
    %c0_2 = arith.constant 0 : index
    %1 = vector.load %arg1[%c0_1, %c0_2] : memref<128x128xbf16, #tpu.memory_space<vmem>>, vector<128x128xbf16>
    %c0_3 = arith.constant 0 : index
    %c0_4 = arith.constant 0 : index
    %2 = vector.load %arg2[%c0_3, %c0_4] : memref<3x128xf32, #tpu.memory_space<vmem>>, vector<3x128xf32>
    %3 = vector.extract_strided_slice %2 {offsets = [0, 0], sizes = [1, 128], strides = [1, 1]} : vector<3x128xf32> to vector<1x128xf32>
    %4 = vector.extract_strided_slice %2 {offsets = [1, 0], sizes = [1, 128], strides = [1, 1]} : vector<3x128xf32> to vector<1x128xf32>
    %5 = vector.extract_strided_slice %2 {offsets = [2, 0], sizes = [1, 128], strides = [1, 1]} : vector<3x128xf32> to vector<1x128xf32>
    %cst = arith.constant dense<0.000000e+00> : vector<32x128xf32>
    %6 = tpu.matmul %0, %1, %cst {dimension_numbers = #tpu.dot_dimension_numbers<[1], [0], [0], [1], [0, 0, 1, 1], [], []>} : vector<32x128xbf16>, vector<128x128xbf16>, vector<32x128xf32> -> vector<32x128xf32>
    %7 = vector.broadcast %3 : vector<1x128xf32> to vector<32x128xf32>
    %8 = arith.addf %6, %7 : vector<32x128xf32>
    %cst_5 = arith.constant 0.000000e+00 : f32
    %9 = vector.broadcast %cst_5 : f32 to vector<32x128xf32>
    %10 = arith.maximumf %8, %9 : vector<32x128xf32>
    %cst_6 = arith.constant dense<0.000000e+00> : vector<128xf32>
    %11 = vector.multi_reduction <add>, %10, %cst_6 [0] : vector<32x128xf32> to vector<128xf32>
    %12 = vector.shape_cast %11 : vector<128xf32> to vector<1x128xf32>
    %13 = arith.mulf %10, %10 : vector<32x128xf32>
    %cst_7 = arith.constant dense<0.000000e+00> : vector<128xf32>
    %14 = vector.multi_reduction <add>, %13, %cst_7 [0] : vector<32x128xf32> to vector<128xf32>
    %15 = vector.shape_cast %14 : vector<128xf32> to vector<1x128xf32>
    %cst_8 = arith.constant 3.125000e-02 : f32
    %16 = vector.broadcast %cst_8 : f32 to vector<1x128xf32>
    %17 = arith.mulf %12, %16 : vector<1x128xf32>
    %cst_9 = arith.constant 3.125000e-02 : f32
    %18 = vector.broadcast %cst_9 : f32 to vector<1x128xf32>
    %19 = arith.mulf %15, %18 : vector<1x128xf32>
    %20 = arith.mulf %17, %17 : vector<1x128xf32>
    %21 = arith.subf %19, %20 : vector<1x128xf32>
    %cst_10 = arith.constant 0.000000e+00 : f32
    %22 = vector.broadcast %cst_10 : f32 to vector<1x128xf32>
    %23 = arith.maximumf %21, %22 : vector<1x128xf32>
    %cst_11 = arith.constant 9.99999974E-6 : f32
    %24 = vector.broadcast %cst_11 : f32 to vector<1x128xf32>
    %25 = arith.addf %23, %24 : vector<1x128xf32>
    %26 = math.rsqrt %25 : vector<1x128xf32>
    %27 = vector.broadcast %17 : vector<1x128xf32> to vector<32x128xf32>
    %28 = arith.subf %10, %27 : vector<32x128xf32>
    %29 = vector.broadcast %26 : vector<1x128xf32> to vector<32x128xf32>
    %30 = arith.mulf %28, %29 : vector<32x128xf32>
    %31 = vector.broadcast %4 : vector<1x128xf32> to vector<32x128xf32>
    %32 = arith.mulf %31, %30 : vector<32x128xf32>
    %33 = vector.broadcast %5 : vector<1x128xf32> to vector<32x128xf32>
    %34 = arith.addf %32, %33 : vector<32x128xf32>
    %35 = arith.truncf %34 : vector<32x128xf32> to vector<32x128xbf16>
    %c0_12 = arith.constant 0 : index
    %c0_13 = arith.constant 0 : index
    %36 = vector.load %arg3[%c0_12, %c0_13] : memref<128x128xbf16, #tpu.memory_space<vmem>>, vector<128x128xbf16>
    %c0_14 = arith.constant 0 : index
    %c0_15 = arith.constant 0 : index
    %37 = vector.load %arg4[%c0_14, %c0_15] : memref<3x128xf32, #tpu.memory_space<vmem>>, vector<3x128xf32>
    %38 = vector.extract_strided_slice %37 {offsets = [0, 0], sizes = [1, 128], strides = [1, 1]} : vector<3x128xf32> to vector<1x128xf32>
    %39 = vector.extract_strided_slice %37 {offsets = [1, 0], sizes = [1, 128], strides = [1, 1]} : vector<3x128xf32> to vector<1x128xf32>
    %40 = vector.extract_strided_slice %37 {offsets = [2, 0], sizes = [1, 128], strides = [1, 1]} : vector<3x128xf32> to vector<1x128xf32>
    %cst_16 = arith.constant dense<0.000000e+00> : vector<32x128xf32>
    %41 = tpu.matmul %35, %36, %cst_16 {dimension_numbers = #tpu.dot_dimension_numbers<[1], [0], [0], [1], [0, 0, 1, 1], [], []>} : vector<32x128xbf16>, vector<128x128xbf16>, vector<32x128xf32> -> vector<32x128xf32>
    %42 = vector.broadcast %38 : vector<1x128xf32> to vector<32x128xf32>
    %43 = arith.addf %41, %42 : vector<32x128xf32>
    %cst_17 = arith.constant 0.000000e+00 : f32
    %44 = vector.broadcast %cst_17 : f32 to vector<32x128xf32>
    %45 = arith.maximumf %43, %44 : vector<32x128xf32>
    %cst_18 = arith.constant dense<0.000000e+00> : vector<128xf32>
    %46 = vector.multi_reduction <add>, %45, %cst_18 [0] : vector<32x128xf32> to vector<128xf32>
    %47 = vector.shape_cast %46 : vector<128xf32> to vector<1x128xf32>
    %48 = arith.mulf %45, %45 : vector<32x128xf32>
    %cst_19 = arith.constant dense<0.000000e+00> : vector<128xf32>
    %49 = vector.multi_reduction <add>, %48, %cst_19 [0] : vector<32x128xf32> to vector<128xf32>
    %50 = vector.shape_cast %49 : vector<128xf32> to vector<1x128xf32>
    %cst_20 = arith.constant 3.125000e-02 : f32
    %51 = vector.broadcast %cst_20 : f32 to vector<1x128xf32>
    %52 = arith.mulf %47, %51 : vector<1x128xf32>
    %cst_21 = arith.constant 3.125000e-02 : f32
    %53 = vector.broadcast %cst_21 : f32 to vector<1x128xf32>
    %54 = arith.mulf %50, %53 : vector<1x128xf32>
    %55 = arith.mulf %52, %52 : vector<1x128xf32>
    %56 = arith.subf %54, %55 : vector<1x128xf32>
    %cst_22 = arith.constant 0.000000e+00 : f32
    %57 = vector.broadcast %cst_22 : f32 to vector<1x128xf32>
    %58 = arith.maximumf %56, %57 : vector<1x128xf32>
    %cst_23 = arith.constant 9.99999974E-6 : f32
    %59 = vector.broadcast %cst_23 : f32 to vector<1x128xf32>
    %60 = arith.addf %58, %59 : vector<1x128xf32>
    %61 = math.rsqrt %60 : vector<1x128xf32>
    %62 = vector.broadcast %52 : vector<1x128xf32> to vector<32x128xf32>
    %63 = arith.subf %45, %62 : vector<32x128xf32>
    %64 = vector.broadcast %61 : vector<1x128xf32> to vector<32x128xf32>
    %65 = arith.mulf %63, %64 : vector<32x128xf32>
    %66 = vector.broadcast %39 : vector<1x128xf32> to vector<32x128xf32>
    %67 = arith.mulf %66, %65 : vector<32x128xf32>
    %68 = vector.broadcast %40 : vector<1x128xf32> to vector<32x128xf32>
    %69 = arith.addf %67, %68 : vector<32x128xf32>
    %c0_24 = arith.constant 0 : index
    %c0_25 = arith.constant 0 : index
    %70 = vector.load %arg5[%c0_24, %c0_25] : memref<32x128xf32, #tpu.memory_space<vmem>>, vector<32x128xf32>
    tpu.vector_store %arg5[%c0_24, %c0_25], %69 {strides = array<i32>} : memref<32x128xf32, #tpu.memory_space<vmem>>, vector<32x128xf32>,
    return
  }
}

</mosaic_0001>

<bundles_post_ra>
// kernel: mlp_forward.1
= control target key start
LH: loop header
LB: loop body
LE: loop exit
PB: predicated region body
PF: predicated region fallthrough
CT: control target
= control target key end

     0   :  { %s609_s0 = inlined_call_operand.vmem [shape: bf16[32,128], index: 0, kind: input, shape index: {}]   ;;  %s610_s1 = inlined_call_operand.vmem [shape: bf16[128,128], index: 1, kind: input, shape index: {}]   ;;  %s611_s2 = inlined_call_operand.vmem [shape: f32[3,128], index: 2, kind: input, shape index: {}]   ;;  %s612_s3 = inlined_call_operand.vmem [shape: bf16[128,128], index: 3, kind: input, shape index: {}]   ;;  %s613_s4 = inlined_call_operand.vmem [shape: f32[3,128], index: 4, kind: input, shape index: {}]   ;;  %s614_s5 = inlined_call_operand.hbm [shape: f32[32,128], index: 5, kind: output, shape index: {}]  }
   0x1   :  { %v432_v0 = vld [vmem:[%s610_s1 + $0x38] sm:$0xff]  ;;  %v431_v1 = vld [vmem:[%s610_s1 + $0x30] sm:$0xff] }
   0x2   :  { %103 = vmatpush.bf16.msra.mxu0 %v432_v0  ;;  %441 = vmatpush.bf16.msra.mxu2 %v432_v0 }
   0x3   :  { %10 = vsyncpa [#allocation3], 0  ;;  %v430_v2 = vld [vmem:[%s610_s1 + $0x28] sm:$0xff]  ;;  %v429_v3 = vld [vmem:[%s610_s1 + $0x20] sm:$0xff]  ;;  %s339_s7 = sshll.u32 %s614_s5, 4  ;;  %s491_s8 = smov 128   ;;  %s340_s7 = int_to_ptr.hbm [resolvable:$true] %s339_s7 }
   0x4   :  { %v428_v4 = vld [vmem:[%s610_s1 + $0x18] sm:$0xff]  ;;  %v427_v5 = vld [vmem:[%s610_s1 + $0x10] sm:$0xff]  ;;  %v426_v6 = vld [vmem:[%s610_s1 + $0x8] sm:$0xff]  ;;  %s492_s9 = smov 8  }
   0x5   :  { %v425_v7 = vld [vmem:[%s610_s1] sm:$0xff]  ;;  %v424_v9 = vld [vmem:[%s609_s0 + $0x8] sm:$0xff]  ;;  %v440_v13 = vld [vmem:[%s612_s3 + $0x38] sm:$0xff] }
   0x6   :  { %104 = vmatpush.bf16.msra.mxu0 %v431_v1  ;;  %442 = vmatpush.bf16.msra.mxu2 %v431_v1  ;;  %v423_v8 = vld [vmem:[%s609_s0] sm:$0xff]  ;;  %v439_v17 = vld [vmem:[%s612_s3 + $0x30] sm:$0xff]  ;;  %v438_v22 = vld [vmem:[%s612_s3 + $0x28] sm:$0xff] }
   0x7   :  { %v556_v10 = vld [vmem:[%s611_s2] sm:$0x7]  ;;  %250 = vmatpush.bf16.msra.mxu1 %v440_v13  ;;  %449 = vmatpush.bf16.msra.mxu3 %v440_v13  ;;  %v436_v34 = vld [vmem:[%s612_s3 + $0x18] sm:$0xff]  ;;  %v435_v40 = vld [vmem:[%s612_s3 + $0x10] sm:$0xff] }
   0x8   :  { %v42_v12 = vperm.slane %v556_v10, 0  ;;  %v437_v28 = vld [vmem:[%s612_s3 + $0x20] sm:$0xff]  ;;  %v434_v45 = vld [vmem:[%s612_s3 + $0x8] sm:$0xff]  ;;  %v172_v1 = vperm.slane %v556_v10, 1 }
   0x9   :  { %v433_v50 = vld [vmem:[%s612_s3] sm:$0xff] }
   0xa   :  { %105 = vmatpush.bf16.msra.mxu0 %v430_v2  ;;  %443 = vmatpush.bf16.msra.mxu2 %v430_v2 }
   0xb   :  { %251 = vmatpush.bf16.msra.mxu1 %v439_v17  ;;  %450 = vmatpush.bf16.msra.mxu3 %v439_v17 }
   0xe   :  { %106 = vmatpush.bf16.msra.mxu0 %v429_v3  ;;  %444 = vmatpush.bf16.msra.mxu2 %v429_v3 }
   0xf   :  { %252 = vmatpush.bf16.msra.mxu1 %v438_v22  ;;  %451 = vmatpush.bf16.msra.mxu3 %v438_v22 }
  0x12   :  { %107 = vmatpush.bf16.msra.mxu0 %v428_v4  ;;  %445 = vmatpush.bf16.msra.mxu2 %v428_v4 }
  0x13   :  { %253 = vmatpush.bf16.msra.mxu1 %v437_v28  ;;  %452 = vmatpush.bf16.msra.mxu3 %v437_v28 }
  0x16   :  { %108 = vmatpush.bf16.msra.mxu0 %v427_v5  ;;  %446 = vmatpush.bf16.msra.mxu2 %v427_v5 }
  0x17   :  { %254 = vmatpush.bf16.msra.mxu1 %v436_v34  ;;  %453 = vmatpush.bf16.msra.mxu3 %v436_v34 }
  0x1a   :  { %109 = vmatpush.bf16.msra.mxu0 %v426_v6  ;;  %447 = vmatpush.bf16.msra.mxu2 %v426_v6 }
  0x1b   :  { %255 = vmatpush.bf16.msra.mxu1 %v435_v40  ;;  %454 = vmatpush.bf16.msra.mxu3 %v435_v40 }
  0x1e   :  { %110 = vmatpush.bf16.msra.mxu0 %v425_v7  ;;  %448 = vmatpush.bf16.msra.mxu2 %v425_v7 }
  0x1f   :  { %256 = vmatpush.bf16.msra.mxu1 %v434_v45  ;;  %455 = vmatpush.bf16.msra.mxu3 %v434_v45 }
  0x21   :  { %111 = vmatmul.bf16.vlgmr.msra.gmra.mxu0 %v423_v8  ;;  %116 = vmatmul.bf16.vlgmr.msra.gmra.mxu2 %v424_v9  ;;  %v177_v8 = vperm.slane %v556_v10, 2  ;;  %v200_v10 = vld [vmem:[%s613_s4] sm:$0x7]  ;;  %s490_s4 = smov [#allocation2]  }
  0x22   :  { %s337_s29 = sshll.u32 %s490_s4, 4  ;;  %s338_s29 = int_to_ptr.vmem [resolvable:$true] %s337_s29 }
  0x23   :  { %257 = vmatpush.bf16.msra.mxu1 %v433_v50  ;;  %456 = vmatpush.bf16.msra.mxu3 %v433_v50 }
  0x9e   :  { %v112_v11 = vpop.f32.mrf.mxu0 }
  0x9f   :  { %v113_v14 = vadd.f32 %v112_v11, %v42_v12 }
  0xa1   :  { %v565_v18 = vmax.f32 %v113_v14, 0.0 }
  0xa3   :  { %v135_v23 = vmul.f32 %v565_v18, %v565_v18 }
  0xa4   :  { %v117_v15 = vpop.f32.mrf.mxu2 }
  0xa5   :  { %v118_v19 = vadd.f32 %v117_v15, %v42_v12 }
  0xa6   :  { %v114_v16 = vpop.f32.mrf.mxu0 }
  0xa7   :  { %v115_v20 = vadd.f32 %v114_v16, %v42_v12  ;;  %v574_v24 = vmax.f32 %v118_v19, 0.0 }
  0xa9   :  { %v567_v21 = vmax.f32 %v115_v20, 0.0  ;;  %v137_v31 = vmul.f32 %v574_v24, %v574_v24 }
  0xab   :  { %v126_v25 = vadd.f32 %v567_v21, %v565_v18  ;;  %v136_v26 = vmul.f32 %v567_v21, %v567_v21 }
  0xac   :  { %v119_v27 = vpop.f32.mrf.mxu2 }
  0xad   :  { %v139_v29 = vadd.f32 %v136_v26, %v135_v23  ;;  %v120_v30 = vadd.f32 %v119_v27, %v42_v12  ;;  %v127_v33 = vadd.f32 %v126_v25, %v574_v24 }
  0xaf   :  { %v125_v32 = vmax.f32 %v120_v30, 0.0  ;;  %v140_v37 = vadd.f32 %v139_v29, %v137_v31 }
  0xb1   :  { %v128_v35 = vadd.f32 %v127_v33, %v125_v32  ;;  %v138_v36 = vmul.f32 %v125_v32, %v125_v32 }
  0xb3   :  { %v129_v38 = vrot.slane %v128_v35, 4  ;;  %v141_v39 = vadd.f32 %v140_v37, %v138_v36 }
  0xb5   :  { %v130_v41 = vadd.f32 %v129_v38, %v128_v35  ;;  %v142_v42 = vrot.slane %v141_v39, 4 }
  0xb7   :  { %v131_v43 = vrot.slane %v130_v41, 2  ;;  %v143_v44 = vadd.f32 %v142_v42, %v141_v39 }
  0xb9   :  { %v132_v46 = vadd.f32 %v131_v43, %v130_v41  ;;  %v144_v47 = vrot.slane %v143_v44, 2 }
  0xbb   :  { %v133_v48 = vrot.slane %v132_v46, 1  ;;  %v145_v49 = vadd.f32 %v144_v47, %v143_v44 }
  0xbd   :  { %v134_v51 = vadd.f32 %v133_v48, %v132_v46  ;;  %v146_v52 = vrot.slane %v145_v49, 1 }
  0xbf   :  { %v147_v53 = vadd.f32 %v146_v52, %v145_v49  ;;  %v148_v54 = vmul.f32 0.03125, %v134_v51 }
  0xc1   :  { %v149_v55 = vmul.f32 0.03125, %v147_v53  ;;  %v150_v56 = vmul.f32 %v148_v54, %v148_v54  ;;  %v167_v3 = vsub.f32 %v125_v32, %v148_v54  ;;  %v164_v4 = vsub.f32 %v565_v18, %v148_v54 }
  0xc2   :  { %v165_v5 = vsub.f32 %v567_v21, %v148_v54  ;;  %v166_v6 = vsub.f32 %v574_v24, %v148_v54  ;;  %v201_v24 = vperm.slane %v200_v10, 0 }
  0xc3   :  { %v151_v57 = vsub.f32 %v149_v55, %v150_v56 }
  0xc5   :  { %v152_v58 = vmax.f32 %v151_v57, 0.0 }
  0xc7   :  { %v153_v59 = vadd.f32 1e-05, %v152_v58 }
  0xc9   :  { %460 = vrsqrt.f32 %v153_v59  ;;  %vm160_vm1 = vweird.f32 %v153_v59 }
  0xcf   :  { %v461_v60 = vpop.eup %460 }
  0xd0   :  { %v155_v61 = vmul.f32 %v461_v60, %v153_v59  ;;  %vm161_vm0 = vweird.f32 %v461_v60 }
  0xd1   :  { %vm162_vm2 = vmor %vm160_vm1, %vm161_vm0 }
  0xd2   :  { %v156_v62 = vmul.f32 %v461_v60, %v155_v61 }
  0xd4   :  { %v157_v63 = vmul.f32 0.5, %v156_v62 }
  0xd6   :  { %v158_v0 = vsub.f32 1.5, %v157_v63 }
  0xd8   :  { %v159_v2 = vmul.f32 %v461_v60, %v158_v0 }
  0xda   :  { %v163_v7 = vsel %vm162_vm2, %v461_v60, %v159_v2 }
  0xdb   :  { %v168_v9 = vmul.f32 %v164_v4, %v163_v7  ;;  %v169_v11 = vmul.f32 %v165_v5, %v163_v7  ;;  %v170_v12 = vmul.f32 %v166_v6, %v163_v7  ;;  %v171_v13 = vmul.f32 %v167_v3, %v163_v7 }
  0xdc   :  { %v319_v6 = vperm.slane %v200_v10, 1 }
  0xdd   :  { %v173_v14 = vmul.f32 %v172_v1, %v168_v9  ;;  %v174_v15 = vmul.f32 %v172_v1, %v169_v11  ;;  %v175_v16 = vmul.f32 %v172_v1, %v170_v12  ;;  %v176_v17 = vmul.f32 %v172_v1, %v171_v13 }
  0xde   :  { %v324_v13 = vperm.slane %v200_v10, 2 }
  0xdf   :  { %v178_v19 = vadd.f32 %v177_v8, %v173_v14  ;;  %v179_v20 = vadd.f32 %v177_v8, %v174_v15  ;;  %v180_v22 = vadd.f32 %v177_v8, %v175_v16  ;;  %v181_v23 = vadd.f32 %v177_v8, %v176_v17 }
  0xe1   :  { %v182_v18 = vpack.c.bf16 %v179_v20, %v178_v19  ;;  %v183_v25 = vpack.c.bf16 %v181_v23, %v180_v22 }
  0xe3   :  { %258 = vmatmul.bf16.vlgmr.msra.gmra.mxu1 %v182_v18  ;;  %263 = vmatmul.bf16.vlgmr.msra.gmra.mxu3 %v183_v25 }
 0x160   :  { %v259_v21 = vpop.f32.mrf.mxu1 }
 0x161   :  { %v260_v26 = vadd.f32 %v259_v21, %v201_v24 }
 0x163   :  { %v269_v29 = vmax.f32 %v260_v26, 0.0 }
 0x165   :  { %v282_v33 = vmul.f32 %v269_v29, %v269_v29 }
 0x166   :  { %v264_v27 = vpop.f32.mrf.mxu3 }
 0x167   :  { %v265_v30 = vadd.f32 %v264_v27, %v201_v24 }
 0x168   :  { %v261_v28 = vpop.f32.mrf.mxu1 }
 0x169   :  { %v262_v31 = vadd.f32 %v261_v28, %v201_v24  ;;  %v271_v34 = vmax.f32 %v265_v30, 0.0 }
 0x16b   :  { %v270_v32 = vmax.f32 %v262_v31, 0.0  ;;  %v284_v40 = vmul.f32 %v271_v34, %v271_v34 }
 0x16d   :  { %v273_v35 = vadd.f32 %v270_v32, %v269_v29  ;;  %v283_v36 = vmul.f32 %v270_v32, %v270_v32 }
 0x16e   :  { %v266_v37 = vpop.f32.mrf.mxu3 }
 0x16f   :  { %v286_v38 = vadd.f32 %v283_v36, %v282_v33  ;;  %v267_v39 = vadd.f32 %v266_v37, %v201_v24  ;;  %v274_v42 = vadd.f32 %v273_v35, %v271_v34 }
 0x171   :  { %v272_v41 = vmax.f32 %v267_v39, 0.0  ;;  %v287_v45 = vadd.f32 %v286_v38, %v284_v40 }
 0x173   :  { %v275_v43 = vadd.f32 %v274_v42, %v272_v41  ;;  %v285_v44 = vmul.f32 %v272_v41, %v272_v41 }
 0x175   :  { %v276_v46 = vrot.slane %v275_v43, 4  ;;  %v288_v47 = vadd.f32 %v287_v45, %v285_v44 }
 0x177   :  { %v277_v48 = vadd.f32 %v276_v46, %v275_v43  ;;  %v289_v49 = vrot.slane %v288_v47, 4 }
 0x179   :  { %v278_v50 = vrot.slane %v277_v48, 2  ;;  %v290_v51 = vadd.f32 %v289_v49, %v288_v47 }
 0x17b   :  { %v279_v52 = vadd.f32 %v278_v50, %v277_v48  ;;  %v291_v53 = vrot.slane %v290_v51, 2 }
 0x17d   :  { %v280_v54 = vrot.slane %v279_v52, 1  ;;  %v292_v55 = vadd.f32 %v291_v53, %v290_v51 }
 0x17f   :  { %v281_v56 = vadd.f32 %v280_v54, %v279_v52  ;;  %v293_v57 = vrot.slane %v292_v55, 1 }
 0x181   :  { %v294_v58 = vadd.f32 %v293_v57, %v292_v55  ;;  %v295_v59 = vmul.f32 0.03125, %v281_v56 }
 0x183   :  { %v296_v60 = vmul.f32 0.03125, %v294_v58  ;;  %v297_v61 = vmul.f32 %v295_v59, %v295_v59  ;;  %v311_v8 = vsub.f32 %v269_v29, %v295_v59  ;;  %v312_v9 = vsub.f32 %v270_v32, %v295_v59 }
 0x184   :  { %v313_v11 = vsub.f32 %v271_v34, %v295_v59  ;;  %v314_v12 = vsub.f32 %v272_v41, %v295_v59 }
 0x185   :  { %v298_v62 = vsub.f32 %v296_v60, %v297_v61 }
 0x187   :  { %v299_v63 = vmax.f32 %v298_v62, 0.0 }
 0x189   :  { %v300_v0 = vadd.f32 1e-05, %v299_v63 }
 0x18b   :  { %462 = vrsqrt.f32 %v300_v0  ;;  %vm307_vm4 = vweird.f32 %v300_v0 }
 0x191   :  { %v463_v1 = vpop.eup %462 }
 0x192   :  { %v302_v2 = vmul.f32 %v463_v1, %v300_v0  ;;  %vm308_vm3 = vweird.f32 %v463_v1 }
 0x193   :  { %vm309_vm5 = vmor %vm307_vm4, %vm308_vm3 }
 0x194   :  { %v303_v3 = vmul.f32 %v463_v1, %v302_v2 }
 0x196   :  { %v304_v4 = vmul.f32 0.5, %v303_v3 }
 0x198   :  { %v305_v5 = vsub.f32 1.5, %v304_v4 }
 0x19a   :  { %v306_v7 = vmul.f32 %v463_v1, %v305_v5 }
 0x19c   :  { %v310_v14 = vsel %vm309_vm5, %v463_v1, %v306_v7 }
 0x19d   :  { %v315_v15 = vmul.f32 %v311_v8, %v310_v14  ;;  %v316_v16 = vmul.f32 %v312_v9, %v310_v14  ;;  %v317_v17 = vmul.f32 %v313_v11, %v310_v14  ;;  %v318_v19 = vmul.f32 %v314_v12, %v310_v14 }
 0x19f   :  { %v320_v20 = vmul.f32 %v319_v6, %v315_v15  ;;  %v321_v22 = vmul.f32 %v319_v6, %v316_v16  ;;  %v322_v23 = vmul.f32 %v319_v6, %v317_v17  ;;  %v323_v18 = vmul.f32 %v319_v6, %v318_v19 }
 0x1a1   :  { %v325_v25 = vadd.f32 %v324_v13, %v320_v20  ;;  %v326_v21 = vadd.f32 %v324_v13, %v321_v22  ;;  %v328_v24 = vadd.f32 %v324_v13, %v323_v18  ;;  %v327_v26 = vadd.f32 %v324_v13, %v322_v23 }
 0x1a3   :  { %332 = vst [vmem:[#allocation2 + $0x18] sm:$0xff] %v328_v24 }
 0x1a4   :  { %329 = vst [vmem:[#allocation2] sm:$0xff] %v325_v25 }
 0x1a5   :  { %330 = vst [vmem:[#allocation2 + $0x8] sm:$0xff] %v326_v21 }
 0x1a6   :  { %331 = vst [vmem:[#allocation2 + $0x10] sm:$0xff] %v327_v26 }
 0x1a7   :  { %345 = dma.vmem_to_hbm [thread:$0]  %s338_s29, 512, %s340_s7, [#allocation3], %s491_s8, %s491_s8, %s492_s9  }
 0x1a8   :  { %488 = dma.done.wait [#allocation3], 512  }
 0x1a9   :  { %489 = vsyncadd [#allocation3], 4294966784 }
 0x1aa   :  { %350 = vsyncpa [#allocation3], 1 }

</bundles_post_ra>
